<compile_context>
chip_gen: v7x
topology: tpu7x:2x2x1
jax: 0.10.0
libtpu: 0.0.40
codegen_flags: <defaults>
</compile_context>

<pallas_src>
import functools

import jax
import jax.numpy as jnp
from jax.experimental import pallas as pl
from jax.experimental.pallas import tpu as pltpu

LOG_SIGMA_MIN = -20.0
LOG_SIGMA_MAX = 2.0

# Exact erf GELU matches PyTorch F.gelu default numerics. Flip to True to trade
# exactness for the (cheaper, EUP-resident) tanh approximation.
USE_TANH_GELU = False


def _gelu(x):
    if USE_TANH_GELU:
        return jax.nn.gelu(x, approximate=True)
    # PyTorch F.gelu default = exact erf-based GELU (computed in f32).
    return 0.5 * x * (1.0 + jax.lax.erf(x * jnp.float32(0.7071067811865476)))


def actor_kernel(action_dim, state_ref, w1_ref, b1_ref, w2_ref, b2_ref,
                 wh_ref, bh_ref, out_ref):
    # state_ref: (TB, D) bf16   weights: bf16   biases: f32   out: (TB, 2A) f32
    x = state_ref[...]

    # layer1 + gelu (bf16 MXU operands, f32 accumulate, f32 elementwise)
    h1 = jnp.dot(x, w1_ref[...], preferred_element_type=jnp.float32) + b1_ref[...]
    h1 = _gelu(h1)

    # layer2 + gelu
    h2 = jnp.dot(h1.astype(jnp.bfloat16), w2_ref[...],
                 preferred_element_type=jnp.float32) + b2_ref[...]
    h2 = _gelu(h2)

    # fused heads: one matmul producing [mu || log_sigma] in (TB, 2A)
    y = jnp.dot(h2.astype(jnp.bfloat16), wh_ref[...],
                preferred_element_type=jnp.float32) + bh_ref[...]

    # lanes [0, A): mu passthrough; lanes [A, 2A): sigma = exp(clip(log_sigma)).
    # clip-then-exp on the whole slab is bounded (<= e^2), then lane-select —
    # keeps the store as one lane-dense (TB, 2A) write instead of two narrow ones.
    lane = jax.lax.broadcasted_iota(jnp.int32, y.shape, 1)
    y_sigma = jnp.exp(jnp.clip(y, LOG_SIGMA_MIN, LOG_SIGMA_MAX))
    out_ref[...] = jnp.where(lane >= action_dim, y_sigma, y)


def prepare_actor_params(params):
    """One-time layout prep: PyTorch (out,in) -> (in,out), fuse heads, cast to bf16."""
    w1 = jnp.asarray(params["w1"]).T.astype(jnp.bfloat16)          # (D, H)
    w2 = jnp.asarray(params["w2"]).T.astype(jnp.bfloat16)          # (H, H)
    wh = jnp.concatenate([jnp.asarray(params["wmu"]).T,
                          jnp.asarray(params["wls"]).T], axis=1
                         ).astype(jnp.bfloat16)                     # (H, 2A)
    b1 = jnp.asarray(params["b1"]).reshape(1, -1).astype(jnp.float32)
    b2 = jnp.asarray(params["b2"]).reshape(1, -1).astype(jnp.float32)
    bh = jnp.concatenate([jnp.asarray(params["bmu"]),
                          jnp.asarray(params["bls"])]).reshape(1, -1).astype(jnp.float32)
    return {"w1": w1, "b1": b1, "w2": w2, "b2": b2, "wh": wh, "bh": bh}


def _round_up(x, m):
    return (x + m - 1) // m * m


@jax.jit
def actor_forward(state, prepped):
    """state: (B, D) float32. prepped: output of prepare_actor_params."""
    B, D = state.shape
    H = prepped["w1"].shape[1]
    A2 = prepped["wh"].shape[1]
    A = A2 // 2

    # Batch tile: multiple of 8 sublanes; capped so double-buffered state blocks
    # stay well inside v7x's 64 MiB VMEM while amortizing per-step overhead.
    TB = min(512, _round_up(B, 8))
    B_pad = _round_up(B, TB)

    x = state.astype(jnp.bfloat16)
    if B_pad != B:
        x = jnp.pad(x, ((0, B_pad - B), (0, 0)))

    out = pl.pallas_call(
        functools.partial(actor_kernel, A),
        out_shape=jax.ShapeDtypeStruct((B_pad, A2), jnp.float32),
        grid_spec=pltpu.PrefetchScalarGridSpec(
            num_scalar_prefetch=0,
            grid=(B_pad // TB,),
            in_specs=[
                pl.BlockSpec((TB, D), lambda i: (i, 0)),   # state streams per tile
                pl.BlockSpec((D, H), lambda i: (0, 0)),    # weights stay VMEM-resident
                pl.BlockSpec((1, H), lambda i: (0, 0)),
                pl.BlockSpec((H, H), lambda i: (0, 0)),
                pl.BlockSpec((1, H), lambda i: (0, 0)),
                pl.BlockSpec((H, A2), lambda i: (0, 0)),
                pl.BlockSpec((1, A2), lambda i: (0, 0)),
            ],
            out_specs=pl.BlockSpec((TB, A2), lambda i: (i, 0)),
        ),
        compiler_params=pltpu.CompilerParams(
            dimension_semantics=("parallel",)),   # megacore sharding on v7x
    )(x, prepped["w1"], prepped["b1"], prepped["w2"], prepped["b2"],
      prepped["wh"], prepped["bh"])

    mu = out[:B, :A]
    sigma = out[:B, A:]
    return mu, sigma


def init_actor_params(key, input_dim, layer_neurons, action_dim):
    """Deterministic synthetic init (PyTorch Linear shapes: W (out,in), b (out,))."""
    ks = jax.random.split(key, 8)

    def lin(kw, kb, fan_in, fan_out):
        bound = 1.0 / jnp.sqrt(fan_in)
        w = jax.random.uniform(kw, (fan_out, fan_in), jnp.float32, -bound, bound)
        b = jax.random.uniform(kb, (fan_out,), jnp.float32, -bound, bound)
        return w, b

    w1, b1 = lin(ks[0], ks[1], input_dim, layer_neurons)
    w2, b2 = lin(ks[2], ks[3], layer_neurons, layer_neurons)
    wmu, bmu = lin(ks[4], ks[5], layer_neurons, action_dim)
    wls, bls = lin(ks[6], ks[7], layer_neurons, action_dim)
    return {"w1": w1, "b1": b1, "w2": w2, "b2": b2,
            "wmu": wmu, "bmu": bmu, "wls": wls, "bls": bls}


def actor_forward_ref(state, params):
    """Pure-JAX f32 reference matching the PyTorch forward."""
    x = state @ params["w1"].T + params["b1"]
    x = jax.nn.gelu(x, approximate=False)
    x = x @ params["w2"].T + params["b2"]
    x = jax.nn.gelu(x, approximate=False)
    mu = x @ params["wmu"].T + params["bmu"]
    log_sigma = x @ params["wls"].T + params["bls"]
    log_sigma = jnp.clip(log_sigma, LOG_SIGMA_MIN, LOG_SIGMA_MAX)
    return mu, jnp.exp(log_sigma)


if __name__ == "__main__":
    # Small shapes consistent with the module: state dim 16, hidden 32, action dim 8.
    B, D, H, A = 4, 16, 32, 8

    key = jax.random.PRNGKey(0)
    k_state, k_params = jax.random.split(key)
    state = jax.random.normal(k_state, (B, D), jnp.float32)
    params = init_actor_params(k_params, D, H, A)
    prepped = prepare_actor_params(params)

    mu, sigma = actor_forward(state, prepped)
    jax.block_until_ready((mu, sigma))

    mu_ref, sigma_ref = actor_forward_ref(state, params)
    assert mu.shape == (B, A) and sigma.shape == (B, A)
    # bf16 MXU operands (f32 accumulate) -> loosened tolerance vs. the f32 reference.
    assert jnp.allclose(mu, mu_ref, atol=2e-2, rtol=2e-2), "mu mismatch"
    assert jnp.allclose(sigma, sigma_ref, atol=2e-2, rtol=2e-2), "sigma mismatch"

    # TODO(synk): Actor.sample() (Normal rsample + tanh squash + log-prob) is stochastic
    # host-side policy logic; only the deterministic forward() hot path is in the kernel.
    print("KERNEL_OK")
</pallas_src>

<mosaic_0001>
module attributes {stable_mosaic.version = 11 : i64} {
  func.func @actor_kernel(%arg0: i32, %arg1: memref<8x16xbf16, #tpu.memory_space<vmem>>, %arg2: memref<16x32xbf16, #tpu.memory_space<vmem>>, %arg3: memref<1x32xf32, #tpu.memory_space<vmem>>, %arg4: memref<32x32xbf16, #tpu.memory_space<vmem>>, %arg5: memref<1x32xf32, #tpu.memory_space<vmem>>, %arg6: memref<32x16xbf16, #tpu.memory_space<vmem>>, %arg7: memref<1x16xf32, #tpu.memory_space<vmem>>, %arg8: memref<8x16xf32, #tpu.memory_space<vmem>>) attributes {dimension_semantics = [#tpu.dimension_semantics<parallel>], iteration_bounds = array<i64: 1>, scalar_prefetch = 0 : i64, scratch_operands = 0 : i64, tpu.core_type = #tpu.core_type<tc>, window_params = [{transform_indices = @transform_0, window_bounds = array<i64: 8, 16>}, {pipeline_mode = #tpu.pipeline_mode<synchronous>, transform_indices = @transform_1, window_bounds = array<i64: 16, 32>}, {pipeline_mode = #tpu.pipeline_mode<synchronous>, transform_indices = @transform_2, window_bounds = array<i64: 1, 32>}, {pipeline_mode = #tpu.pipeline_mode<synchronous>, transform_indices = @transform_3, window_bounds = array<i64: 32, 32>}, {pipeline_mode = #tpu.pipeline_mode<synchronous>, transform_indices = @transform_4, window_bounds = array<i64: 1, 32>}, {pipeline_mode = #tpu.pipeline_mode<synchronous>, transform_indices = @transform_5, window_bounds = array<i64: 32, 16>}, {pipeline_mode = #tpu.pipeline_mode<synchronous>, transform_indices = @transform_6, window_bounds = array<i64: 1, 16>}, {transform_indices = @transform_7, window_bounds = array<i64: 8, 16>}]} {
    %c0 = arith.constant 0 : index
    %c0_0 = arith.constant 0 : index
    %0 = vector.load %arg1[%c0, %c0_0] : memref<8x16xbf16, #tpu.memory_space<vmem>>, vector<8x16xbf16>
    %c0_1 = arith.constant 0 : index
    %c0_2 = arith.constant 0 : index
    %1 = vector.load %arg2[%c0_1, %c0_2] : memref<16x32xbf16, #tpu.memory_space<vmem>>, vector<16x32xbf16>
    %cst = arith.constant dense<0.000000e+00> : vector<8x32xf32>
    %2 = tpu.matmul %0, %1, %cst {dimension_numbers = #tpu.dot_dimension_numbers<[1], [0], [0], [1], [0, 0, 1, 1], [], []>} : vector<8x16xbf16>, vector<16x32xbf16>, vector<8x32xf32> -> vector<8x32xf32>
    %c0_3 = arith.constant 0 : index
    %c0_4 = arith.constant 0 : index
    %3 = vector.load %arg3[%c0_3, %c0_4] : memref<1x32xf32, #tpu.memory_space<vmem>>, vector<1x32xf32>
    %4 = vector.broadcast %3 : vector<1x32xf32> to vector<8x32xf32>
    %5 = arith.addf %2, %4 : vector<8x32xf32>
    %cst_5 = arith.constant 5.000000e-01 : f32
    %6 = vector.broadcast %cst_5 : f32 to vector<8x32xf32>
    %7 = arith.mulf %6, %5 : vector<8x32xf32>
    %cst_6 = arith.constant 0.707106769 : f32
    %8 = vector.broadcast %cst_6 : f32 to vector<8x32xf32>
    %9 = arith.mulf %5, %8 : vector<8x32xf32>
    %10 = math.erf %9 : vector<8x32xf32>
    %cst_7 = arith.constant 1.000000e+00 : f32
    %11 = vector.broadcast %cst_7 : f32 to vector<8x32xf32>
    %12 = arith.addf %11, %10 : vector<8x32xf32>
    %13 = arith.mulf %7, %12 : vector<8x32xf32>
    %14 = arith.truncf %13 : vector<8x32xf32> to vector<8x32xbf16>
    %c0_8 = arith.constant 0 : index
    %c0_9 = arith.constant 0 : index
    %15 = vector.load %arg4[%c0_8, %c0_9] : memref<32x32xbf16, #tpu.memory_space<vmem>>, vector<32x32xbf16>
    %cst_10 = arith.constant dense<0.000000e+00> : vector<8x32xf32>
    %16 = tpu.matmul %14, %15, %cst_10 {dimension_numbers = #tpu.dot_dimension_numbers<[1], [0], [0], [1], [0, 0, 1, 1], [], []>} : vector<8x32xbf16>, vector<32x32xbf16>, vector<8x32xf32> -> vector<8x32xf32>
    %c0_11 = arith.constant 0 : index
    %c0_12 = arith.constant 0 : index
    %17 = vector.load %arg5[%c0_11, %c0_12] : memref<1x32xf32, #tpu.memory_space<vmem>>, vector<1x32xf32>
    %18 = vector.broadcast %17 : vector<1x32xf32> to vector<8x32xf32>
    %19 = arith.addf %16, %18 : vector<8x32xf32>
    %cst_13 = arith.constant 5.000000e-01 : f32
    %20 = vector.broadcast %cst_13 : f32 to vector<8x32xf32>
    %21 = arith.mulf %20, %19 : vector<8x32xf32>
    %cst_14 = arith.constant 0.707106769 : f32
    %22 = vector.broadcast %cst_14 : f32 to vector<8x32xf32>
    %23 = arith.mulf %19, %22 : vector<8x32xf32>
    %24 = math.erf %23 : vector<8x32xf32>
    %cst_15 = arith.constant 1.000000e+00 : f32
    %25 = vector.broadcast %cst_15 : f32 to vector<8x32xf32>
    %26 = arith.addf %25, %24 : vector<8x32xf32>
    %27 = arith.mulf %21, %26 : vector<8x32xf32>
    %28 = arith.truncf %27 : vector<8x32xf32> to vector<8x32xbf16>
    %c0_16 = arith.constant 0 : index
    %c0_17 = arith.constant 0 : index
    %29 = vector.load %arg6[%c0_16, %c0_17] : memref<32x16xbf16, #tpu.memory_space<vmem>>, vector<32x16xbf16>
    %cst_18 = arith.constant dense<0.000000e+00> : vector<8x16xf32>
    %30 = tpu.matmul %28, %29, %cst_18 {dimension_numbers = #tpu.dot_dimension_numbers<[1], [0], [0], [1], [0, 0, 1, 1], [], []>} : vector<8x32xbf16>, vector<32x16xbf16>, vector<8x16xf32> -> vector<8x16xf32>
    %c0_19 = arith.constant 0 : index
    %c0_20 = arith.constant 0 : index
    %31 = vector.load %arg7[%c0_19, %c0_20] : memref<1x16xf32, #tpu.memory_space<vmem>>, vector<1x16xf32>
    %32 = vector.broadcast %31 : vector<1x16xf32> to vector<8x16xf32>
    %33 = arith.addf %30, %32 : vector<8x16xf32>
    %34 = tpu.iota {dimensions = array<i32: 1>} : vector<8x16xi32>
    %cst_21 = arith.constant -2.000000e+01 : f32
    %cst_22 = arith.constant 2.000000e+00 : f32
    %35 = vector.broadcast %cst_21 : f32 to vector<8x16xf32>
    %36 = arith.maximumf %35, %33 : vector<8x16xf32>
    %37 = vector.broadcast %cst_22 : f32 to vector<8x16xf32>
    %38 = arith.minimumf %37, %36 : vector<8x16xf32>
    %39 = math.exp %38 : vector<8x16xf32>
    %c8_i32 = arith.constant 8 : i32
    %40 = vector.broadcast %c8_i32 : i32 to vector<8x16xi32>
    %41 = arith.cmpi sge, %34, %40 : vector<8x16xi32>
    %42 = arith.select %41, %39, %33 : vector<8x16xi1>, vector<8x16xf32>
    %c0_23 = arith.constant 0 : index
    %c0_24 = arith.constant 0 : index
    %43 = vector.load %arg8[%c0_23, %c0_24] : memref<8x16xf32, #tpu.memory_space<vmem>>, vector<8x16xf32>
    tpu.vector_store %arg8[%c0_23, %c0_24], %42 {strides = array<i32>} : memref<8x16xf32, #tpu.memory_space<vmem>>, vector<8x16xf32>,
    return
  }
  func.func @transform_0(%arg0: i32) -> (i32, i32) {
    %c0_i32 = arith.constant 0 : i32
    %c0_i32_0 = arith.constant 0 : i32
    return %arg0, %c0_i32 : i32, i32
  }
  func.func @transform_1(%arg0: i32) -> (i32, i32) {
    %c0_i32 = arith.constant 0 : i32
    %c0_i32_0 = arith.constant 0 : i32
    %c0_i32_1 = arith.constant 0 : i32
    return %c0_i32, %c0_i32_0 : i32, i32
  }
  func.func @transform_2(%arg0: i32) -> (i32, i32) {
    %c0_i32 = arith.constant 0 : i32
    %c0_i32_0 = arith.constant 0 : i32
    %c0_i32_1 = arith.constant 0 : i32
    return %c0_i32, %c0_i32_0 : i32, i32
  }
  func.func @transform_3(%arg0: i32) -> (i32, i32) {
    %c0_i32 = arith.constant 0 : i32
    %c0_i32_0 = arith.constant 0 : i32
    %c0_i32_1 = arith.constant 0 : i32
    return %c0_i32, %c0_i32_0 : i32, i32
  }
  func.func @transform_4(%arg0: i32) -> (i32, i32) {
    %c0_i32 = arith.constant 0 : i32
    %c0_i32_0 = arith.constant 0 : i32
    %c0_i32_1 = arith.constant 0 : i32
    return %c0_i32, %c0_i32_0 : i32, i32
  }
  func.func @transform_5(%arg0: i32) -> (i32, i32) {
    %c0_i32 = arith.constant 0 : i32
    %c0_i32_0 = arith.constant 0 : i32
    %c0_i32_1 = arith.constant 0 : i32
    return %c0_i32, %c0_i32_0 : i32, i32
  }
  func.func @transform_6(%arg0: i32) -> (i32, i32) {
    %c0_i32 = arith.constant 0 : i32
    %c0_i32_0 = arith.constant 0 : i32
    %c0_i32_1 = arith.constant 0 : i32
    return %c0_i32, %c0_i32_0 : i32, i32
  }
  func.func @transform_7(%arg0: i32) -> (i32, i32) {
    %c0_i32 = arith.constant 0 : i32
    %c0_i32_0 = arith.constant 0 : i32
    return %arg0, %c0_i32 : i32, i32
  }
}

</mosaic_0001>

<bundles_post_ra>
// kernel: actor_forward.1
= control target key start
LH: loop header
LB: loop body
LE: loop exit
PB: predicated region body
PF: predicated region fallthrough
CT: control target
= control target key end

     0   :  { %v299_v0 = vmov 0.0   ;;  %vm300_vm0 = vmmov 0   ;;  %vm43_vm1 = vcmask 130048   ;;  %vm116_vm2 = vcmask 261120   ;;  %s375_s1 = inlined_call_operand.vmem [shape: bf16[16,32], index: 1, kind: input, shape index: {}]   ;;  %s376_s0 = inlined_call_operand.vmem [shape: bf16[8,16], index: 0, kind: input, shape index: {}]   ;;  %s377_s3 = inlined_call_operand.vmem [shape: bf16[32,32], index: 3, kind: input, shape index: {}]   ;;  %s378_s2 = inlined_call_operand.vmem [shape: f32[1,32], index: 2, kind: input, shape index: {}]   ;;  %s379_s5 = inlined_call_operand.vmem [shape: bf16[32,16], index: 5, kind: input, shape index: {}]   ;;  %s380_s4 = inlined_call_operand.vmem [shape: f32[1,32], index: 4, kind: input, shape index: {}]   ;;  %s381_s6 = inlined_call_operand.vmem [shape: f32[1,16], index: 6, kind: input, shape index: {}]   ;;  %s382_s7 = inlined_call_operand.vmem [shape: f32[8,16], index: 7, kind: output, shape index: {}]  }
   0x1   :  { %264 = vmatprep.subr.bf16.mxu0 %v299_v0  ;;  %v288_v1 = vld [vmem:[%s375_s1] sm:$0xff]   ;;  %266 = vmatprep.mubr.msk.bf16.mxu0 %vm300_vm0, %v299_v0  ;;  %v290_v4 = vld [vmem:[%s377_s3 + $0x8] sm:$0xff]   ;;  %v232_v40 = vlaneseq }
   0x2   :  { %270 = vmatprep.subr.bf16.mxu1 %v299_v0  ;;  %274 = vmatprep.mubr.msk.bf16.mxu1 %vm300_vm0, %v299_v0  ;;  %v27_v2 = vld [vmem:[%s376_s0] sm:$0xf]  ;;  %v292_v18 = vld [vmem:[%s379_s5 + $0x8] sm:$0xff]  }
   0x3   :  { %265 = vmatpush3.bf16.msra.mxu0 %v288_v1  ;;  %v289_v3 = vld [vmem:[%s377_s3] sm:$0xff]   ;;  %v233_v41 = vand.u32 127, %v232_v40 }
   0x4   :  { %278 = vmatprep.subr.bf16.mxu0 %v299_v0  ;;  %271 = vmatpush3.bf16.msra.mxu1 %v289_v3  ;;  %v245_v5 = vld [vmem:[%s378_s2] ss:$0 sm:$0xff] }
   0x5   :  { %272 = vmatprep.subr.bf16.mxu1 %v299_v0  ;;  %v291_v17 = vld [vmem:[%s379_s5] sm:$0xff]   ;;  %vm238_vm3 = vcmp.ge.s32.totalorder %v233_v41, 8 }
   0x6   :  { %267 = vmatmul.mubr.msk.bf16.vlgmr.msra.gmra.mrb[0].mxu0 %vm43_vm1, %v27_v2  ;;  %v248_v19 = vld [vmem:[%s380_s4] ss:$0 sm:$0xff] }
   0x7   :  { %282 = vmatprep.mubr.msk.bf16.mxu0 %vm300_vm0, %v299_v0  ;;  %279 = vmatpush3.bf16.msra.mxu0 %v291_v17  ;;  %v252_v31 = vld [vmem:[%s381_s6] ss:$0 sm:$0xff] }
   0x8   :  { %273 = vmatpush3.bf16.msra.mxu1 %v290_v4  ;;  %280 = vmatprep.subr.bf16.mxu0 %v299_v0 }
   0xb   :  { %281 = vmatpush3.bf16.msra.mxu0 %v292_v18 }
  0xd9   :  { %v81_v6 = vpop.f32.mrb[0].mxu0 }
  0xda   :  { %v82_v7 = vadd.f32 %v245_v5, %v81_v6  ;;  %v268_v8 = vpop.f32.mrb[1].mxu0 }
  0xdb   :  { %v84_v9 = vpop.f32.mrb[2].mxu0 }
  0xdc   :  { %v88_v10 = vmul.f32 0.70710677, %v82_v7  ;;  %v269_v11 = vpop.f32.mrb[3].mxu0  ;;  %v87_v13 = vmul.f32 0.5, %v82_v7 }
  0xde   :  { %293 = verf.f32 %v88_v10 }
  0xe8   :  { %v294_v12 = vpop.eup %293 }
  0xe9   :  { %v90_v14 = vadd.f32 1.0, %v294_v12 }
  0xeb   :  { %v91_v15 = vmul.f32 %v90_v14, %v87_v13 }
  0xed   :  { %v92_v16 = vpack.c.bf16 %v91_v15, %v91_v15 }
  0xef   :  { %275 = vmatmul.mubr.msk.bf16.vlgmr.msra.gmra.mrb[0].mxu1 %vm116_vm2, %v92_v16 }
 0x1c2   :  { %v154_v20 = vpop.f32.mrb[0].mxu1 }
 0x1c3   :  { %v155_v21 = vadd.f32 %v248_v19, %v154_v20  ;;  %v276_v22 = vpop.f32.mrb[1].mxu1 }
 0x1c4   :  { %v157_v23 = vpop.f32.mrb[2].mxu1 }
 0x1c5   :  { %v161_v24 = vmul.f32 0.70710677, %v155_v21  ;;  %v277_v25 = vpop.f32.mrb[3].mxu1  ;;  %v160_v27 = vmul.f32 0.5, %v155_v21 }
 0x1c7   :  { %295 = verf.f32 %v161_v24 }
 0x1d1   :  { %v296_v26 = vpop.eup %295 }
 0x1d2   :  { %v163_v28 = vadd.f32 1.0, %v296_v26 }
 0x1d4   :  { %v164_v29 = vmul.f32 %v163_v28, %v160_v27 }
 0x1d6   :  { %v165_v30 = vpack.c.bf16 %v164_v29, %v164_v29 }
 0x1d8   :  { %283 = vmatmul.mubr.msk.bf16.vlgmr.msra.gmra.mrb[4].mxu0 %vm116_vm2, %v165_v30 }
 0x2ab   :  { %v226_v32 = vpop.f32.mrb[4].mxu0 }
 0x2ac   :  { %v227_v33 = vadd.f32 %v252_v31, %v226_v32  ;;  %v284_v34 = vpop.f32.mrb[5].mxu0 }
 0x2ad   :  { %v229_v35 = vpop.f32.mrb[6].mxu0 }
 0x2ae   :  { %v234_v36 = vmax.f32 %v227_v33, -20.0  ;;  %v285_v37 = vpop.f32.mrb[7].mxu0 }
 0x2b0   :  { %v235_v38 = vmin.f32 %v234_v36, 2.0 }
 0x2b2   :  { %v236_v39 = vmul.f32 1.442695, %v235_v38 }
 0x2b4   :  { %297 = vpow2.f32 %v236_v39 }
 0x2be   :  { %v298_v42 = vpop.eup %297 }
 0x2bf   :  { %v239_v43 = vsel %vm238_vm3, %v298_v42, %v227_v33 }
 0x2c0   :  { %240 = vst.msk [vmem:[%s382_s7] sm:$0xff] %vm43_vm1, %v239_v43 }

</bundles_post_ra>
